<compile_context>
chip_gen: v7x
topology: tpu7x:2x2x1
jax: 0.10.0
libtpu: 0.0.40
codegen_flags: <defaults>
</compile_context>

<pallas_src>
import jax
import jax.numpy as jnp
from jax import lax
from jax.experimental import pallas as pl
from jax.experimental.pallas import tpu as pltpu

EPS = 1e-5  # PyTorch BatchNorm1d default eps


def _pad_to(n, m):
    return ((n + m - 1) // m) * m


# ------------------------------ Pallas kernel -------------------------------
def _make_fused_kernel(n_tables, n_layers, k_emb_pad):
    """Fused eval-mode forward.  Ref order:
       [cat (bt,T) i32, cont (bt,C) f32, w_emb (Kp,H1) bf16, w_cont (C,H1) bf16,
        shift_1 (1,H1) f32, (w_k, shift_k) for k >= 2, out (bt,HLp) f32]."""

    def kernel(*refs):
        it = iter(refs)
        cat_ref = next(it)                                   # (bt, T) int32
        cont_ref = next(it)                                  # (bt, C) f32
        w_emb_ref = next(it)                                 # (Kp, H1) bf16
        w_cont_ref = next(it)                                # (C, H1) bf16
        s1_ref = next(it)                                    # (1, H1) f32
        rest = [(next(it), next(it)) for _ in range(n_layers - 1)]
        o_ref = next(it)                                     # (bt, HLp) f32

        bt = cat_ref.shape[0]

        # ---- layer 1: multi-hot gather fused with the first Linear ---------
        # Offsets make the per-table index ranges disjoint, so the multi-hot
        # row has exactly one 1 per table and
        #   mh @ w_emb == sum_i table_i[idx_i] @ W1_rows_i.
        idx = cat_ref[...]                                   # (bt, T)
        cols = lax.broadcasted_iota(jnp.int32, (bt, k_emb_pad), 1)
        mh = (idx[:, 0:1] == cols).astype(jnp.float32)
        for t in range(1, n_tables):
            mh = mh + (idx[:, t:t + 1] == cols).astype(jnp.float32)

        # bf16 operands (0/1 exact), f32 accumulation on the MXU.
        h = jnp.dot(mh.astype(jnp.bfloat16), w_emb_ref[...],
                    preferred_element_type=jnp.float32)
        # continuous block: its BN affine is already folded into w_cont/shift_1.
        h = h + jnp.dot(cont_ref[...].astype(jnp.bfloat16), w_cont_ref[...],
                        preferred_element_type=jnp.float32)
        # LinBnDrop epilogue: ReLU -> BN affine (scale pre-folded into W,
        # valid because scale > 0) -> Dropout == identity in eval.
        h = jnp.maximum(h, 0.0) + s1_ref[...]

        # ---- remaining LinBnDrop blocks -------------------------------------
        for w_ref, s_ref in rest:
            h = jnp.dot(h.astype(jnp.bfloat16), w_ref[...],
                        preferred_element_type=jnp.float32)
            h = jnp.maximum(h, 0.0) + s_ref[...]

        o_ref[...] = h                                       # lane-dense store

    return kernel


# --------------------------- parameter building -----------------------------
def init_clinical_params(key, embed_szs, n_cont, layers):
    """Inference-layout parameters mirroring the PyTorch module, with all
    offline folds applied (see module docstring)."""
    n_emb = sum(nf for _, nf in embed_szs)
    n_in = n_emb + n_cont
    sizes = [n_in] + list(layers)
    n_layers = len(layers)
    keys = jax.random.split(key, len(embed_szs) + n_layers)

    params = {"embed_szs": list(embed_szs), "n_cont": n_cont,
              "layers": list(layers)}

    # nn.Embedding tables, N(0,1) like the PyTorch default.
    tables = [jax.random.normal(keys[i], (ni, nf), jnp.float32)
              for i, (ni, nf) in enumerate(embed_szs)]

    # Row offsets into the concatenated (multi-hot) vocabulary.
    offs, r = [], 0
    for ni, _ in embed_szs:
        offs.append(r)
        r += ni
    k_emb = r
    k_emb_pad = _pad_to(k_emb, 8)
    params["offsets"] = jnp.asarray(offs, jnp.int32)

    # LinBnDrop BN (fastai init): gamma=1, beta=0.001, running stats (0,1).
    bn_scale = 1.0 / (1.0 + EPS) ** 0.5
    # bn_cont = plain nn.BatchNorm1d: gamma=1, beta=0, running stats (0,1).
    cont_scale = 1.0 / (1.0 + EPS) ** 0.5
    cont_shift = jnp.zeros((n_cont,), jnp.float32)

    w_rest, shifts = [], []
    for li, (fan_in, fan_out) in enumerate(zip(sizes[:-1], sizes[1:])):
        k = keys[len(embed_szs) + li]
        bound = 1.0 / (fan_in ** 0.5)
        w = jax.random.uniform(k, (fan_in, fan_out), jnp.float32,
                               minval=-bound, maxval=bound)
        w = w * bn_scale                       # fold BN scale (> 0) into W
        beta = jnp.full((fan_out,), 0.001, jnp.float32)
        # Only the final layer width is padded to 128 (lane-dense HBM store);
        # intermediate hidden widths stay natural.
        out_w = _pad_to(fan_out, 128) if li == n_layers - 1 else fan_out

        if li == 0:
            w_emb_rows = w[:n_emb]                            # (n_emb, H1)
            w_cont_rows = w[n_emb:] * cont_scale              # fold bn_cont scale
            shift1 = beta + cont_shift @ w_cont_rows          # fold bn_cont shift
            # fold each embedding table into its W1 rows, then stack.
            fused, rr = [], 0
            for (ni, nf), tbl in zip(embed_szs, tables):
                fused.append(tbl @ w_emb_rows[rr:rr + nf])    # (ni, H1) f32
                rr += nf
            w_emb = jnp.concatenate(fused, axis=0)            # (k_emb, H1)
            params["w_emb"] = (jnp.zeros((k_emb_pad, out_w), jnp.float32)
                               .at[:k_emb, :fan_out].set(w_emb)
                               .astype(jnp.bfloat16))
            params["w_cont"] = (jnp.zeros((n_cont, out_w), jnp.float32)
                                .at[:, :fan_out].set(w_cont_rows)
                                .astype(jnp.bfloat16))
            shifts.append(jnp.zeros((1, out_w), jnp.float32)
                          .at[0, :fan_out].set(shift1))
        else:
            w_rest.append((jnp.zeros((fan_in, out_w), jnp.float32)
                           .at[:, :fan_out].set(w)).astype(jnp.bfloat16))
            shifts.append(jnp.zeros((1, out_w), jnp.float32)
                          .at[0, :fan_out].set(beta))

    params["w_rest"] = w_rest
    params["shifts"] = shifts
    return params


# --------------------------------- forward ----------------------------------
def clinical_forward(params, categorical, continuous):
    """categorical: (B, n_tables) int, continuous: (B, n_cont) float."""
    B = categorical.shape[0]
    n_tables = len(params["embed_szs"])
    n_layers = len(params["layers"])
    n_out = params["layers"][-1]
    n_cont = params["n_cont"]
    out_pad = params["shifts"][-1].shape[1]
    k_emb_pad = params["w_emb"].shape[0]

    # One (B, T) int32 array with per-table row offsets pre-added: one DMA,
    # feeds the in-kernel multi-hot build directly.
    cat = categorical.astype(jnp.int32) + params["offsets"][None, :]
    cont = continuous.astype(jnp.float32)

    # Batch tiling on a "parallel" grid axis (v7x: work shards across both
    # TensorCores).  Tile sizes stay far below v5e's 16 MiB scoped-VMEM
    # default even with double buffering, so no vmem_limit override needed.
    bt = min(_pad_to(B, 8), 512)
    b_pad = _pad_to(B, bt)
    if b_pad != B:
        cat = jnp.pad(cat, ((0, b_pad - B), (0, 0)))
        cont = jnp.pad(cont, ((0, b_pad - B), (0, 0)))

    weights = [params["w_emb"], params["w_cont"], params["shifts"][0]]
    for w, s in zip(params["w_rest"], params["shifts"][1:]):
        weights += [w, s]

    in_specs = ([pl.BlockSpec((bt, n_tables), lambda b: (b, 0)),
                 pl.BlockSpec((bt, n_cont), lambda b: (b, 0))]
                # constant index maps -> weights loaded once, stay resident.
                + [pl.BlockSpec(w.shape, lambda b: (0, 0)) for w in weights])

    out = pl.pallas_call(
        _make_fused_kernel(n_tables, n_layers, k_emb_pad),
        out_shape=jax.ShapeDtypeStruct((b_pad, out_pad), jnp.float32),
        grid=(b_pad // bt,),
        in_specs=in_specs,
        out_specs=pl.BlockSpec((bt, out_pad), lambda b: (b, 0)),
        compiler_params=pltpu.CompilerParams(
            dimension_semantics=("parallel",)),
    )(cat, cont, *weights)
    # strip batch padding and the final-layer lane padding.
    return out[:B, :n_out]


def clinical_forward_ref(params, categorical, continuous):
    """Pure-JAX reference on the same (folded, bf16) parameters, using a real
    gather instead of the kernel's multi-hot matmul."""
    idx = categorical.astype(jnp.int32) + params["offsets"][None, :]
    h = jnp.sum(params["w_emb"][idx].astype(jnp.float32), axis=1)
    h = h + jnp.dot(continuous.astype(jnp.bfloat16), params["w_cont"],
                    preferred_element_type=jnp.float32)
    h = jnp.maximum(h, 0.0) + params["shifts"][0]
    for w, s in zip(params["w_rest"], params["shifts"][1:]):
        h = jnp.dot(h.astype(jnp.bfloat16), w,
                    preferred_element_type=jnp.float32)
        h = jnp.maximum(h, 0.0) + s
    return h[:, :params["layers"][-1]]


# ----------------------------------- main ------------------------------------
if __name__ == "__main__":
    # ClinicalModel(size_cat=3, size_cont=8, layers=[64, 32],
    #               embed_size=[(12, 8), (9, 8), (5, 8)], dropout=0.5,
    #               batch_norm=True), eval mode.
    embed_size = [(12, 8), (9, 8), (5, 8)]
    size_cont = 8
    layers = [64, 32]
    batch = 8

    key = jax.random.PRNGKey(0)
    kp, kcat, kcont = jax.random.split(key, 3)

    params = init_clinical_params(kp, embed_size, size_cont, layers)

    cat_cols = [
        jax.random.randint(jax.random.fold_in(kcat, i), (batch, 1), 0, ni)
        for i, (ni, _) in enumerate(embed_size)
    ]
    categorical = jnp.concatenate(cat_cols, axis=1).astype(jnp.int32)
    continuous = jax.random.normal(kcont, (batch, size_cont), jnp.float32)

    out = jax.block_until_ready(
        clinical_forward(params, categorical, continuous))

    assert out.shape == (batch, layers[-1]), out.shape
    assert out.dtype == jnp.float32

    ref = jax.block_until_ready(
        clinical_forward_ref(params, categorical, continuous))
    assert jnp.allclose(out, ref, atol=1e-2, rtol=1e-2), (
        float(jnp.max(jnp.abs(out - ref))))

    print("KERNEL_OK")
</pallas_src>

<mosaic_0001>
module attributes {stable_mosaic.version = 11 : i64} {
  func.func @kernel(%arg0: i32, %arg1: memref<8x3xi32, #tpu.memory_space<vmem>>, %arg2: memref<8x8xf32, #tpu.memory_space<vmem>>, %arg3: memref<32x64xbf16, #tpu.memory_space<vmem>>, %arg4: memref<8x64xbf16, #tpu.memory_space<vmem>>, %arg5: memref<1x64xf32, #tpu.memory_space<vmem>>, %arg6: memref<64x128xbf16, #tpu.memory_space<vmem>>, %arg7: memref<1x128xf32, #tpu.memory_space<vmem>>, %arg8: memref<8x128xf32, #tpu.memory_space<vmem>>) attributes {dimension_semantics = [#tpu.dimension_semantics<parallel>], iteration_bounds = array<i64: 1>, scalar_prefetch = 0 : i64, scratch_operands = 0 : i64, tpu.core_type = #tpu.core_type<tc>, window_params = [{transform_indices = @transform_0, window_bounds = array<i64: 8, 3>}, {transform_indices = @transform_1, window_bounds = array<i64: 8, 8>}, {pipeline_mode = #tpu.pipeline_mode<synchronous>, transform_indices = @transform_2, window_bounds = array<i64: 32, 64>}, {pipeline_mode = #tpu.pipeline_mode<synchronous>, transform_indices = @transform_3, window_bounds = array<i64: 8, 64>}, {pipeline_mode = #tpu.pipeline_mode<synchronous>, transform_indices = @transform_4, window_bounds = array<i64: 1, 64>}, {pipeline_mode = #tpu.pipeline_mode<synchronous>, transform_indices = @transform_5, window_bounds = array<i64: 64, 128>}, {pipeline_mode = #tpu.pipeline_mode<synchronous>, transform_indices = @transform_6, window_bounds = array<i64: 1, 128>}, {transform_indices = @transform_7, window_bounds = array<i64: 8, 128>}]} {
    %c0 = arith.constant 0 : index
    %c0_0 = arith.constant 0 : index
    %0 = vector.load %arg1[%c0, %c0_0] : memref<8x3xi32, #tpu.memory_space<vmem>>, vector<8x3xi32>
    %1 = tpu.iota {dimensions = array<i32: 1>} : vector<8x32xi32>
    %2 = vector.extract_strided_slice %0 {offsets = [0, 0], sizes = [8, 1], strides = [1, 1]} : vector<8x3xi32> to vector<8x1xi32>
    %3 = vector.broadcast %2 : vector<8x1xi32> to vector<8x32xi32>
    %4 = arith.cmpi eq, %3, %1 : vector<8x32xi32>
    %5 = arith.extui %4 : vector<8x32xi1> to vector<8x32xi32>
    %6 = arith.sitofp %5 : vector<8x32xi32> to vector<8x32xf32>
    %7 = vector.extract_strided_slice %0 {offsets = [0, 1], sizes = [8, 1], strides = [1, 1]} : vector<8x3xi32> to vector<8x1xi32>
    %8 = vector.broadcast %7 : vector<8x1xi32> to vector<8x32xi32>
    %9 = arith.cmpi eq, %8, %1 : vector<8x32xi32>
    %10 = arith.extui %9 : vector<8x32xi1> to vector<8x32xi32>
    %11 = arith.sitofp %10 : vector<8x32xi32> to vector<8x32xf32>
    %12 = arith.addf %6, %11 : vector<8x32xf32>
    %13 = vector.extract_strided_slice %0 {offsets = [0, 2], sizes = [8, 1], strides = [1, 1]} : vector<8x3xi32> to vector<8x1xi32>
    %14 = vector.broadcast %13 : vector<8x1xi32> to vector<8x32xi32>
    %15 = arith.cmpi eq, %14, %1 : vector<8x32xi32>
    %16 = arith.extui %15 : vector<8x32xi1> to vector<8x32xi32>
    %17 = arith.sitofp %16 : vector<8x32xi32> to vector<8x32xf32>
    %18 = arith.addf %12, %17 : vector<8x32xf32>
    %19 = arith.truncf %18 : vector<8x32xf32> to vector<8x32xbf16>
    %c0_1 = arith.constant 0 : index
    %c0_2 = arith.constant 0 : index
    %20 = vector.load %arg3[%c0_1, %c0_2] : memref<32x64xbf16, #tpu.memory_space<vmem>>, vector<32x64xbf16>
    %cst = arith.constant dense<0.000000e+00> : vector<8x64xf32>
    %21 = tpu.matmul %19, %20, %cst {dimension_numbers = #tpu.dot_dimension_numbers<[1], [0], [0], [1], [0, 0, 1, 1], [], []>} : vector<8x32xbf16>, vector<32x64xbf16>, vector<8x64xf32> -> vector<8x64xf32>
    %c0_3 = arith.constant 0 : index
    %c0_4 = arith.constant 0 : index
    %22 = vector.load %arg2[%c0_3, %c0_4] : memref<8x8xf32, #tpu.memory_space<vmem>>, vector<8x8xf32>
    %23 = arith.truncf %22 : vector<8x8xf32> to vector<8x8xbf16>
    %c0_5 = arith.constant 0 : index
    %c0_6 = arith.constant 0 : index
    %24 = vector.load %arg4[%c0_5, %c0_6] : memref<8x64xbf16, #tpu.memory_space<vmem>>, vector<8x64xbf16>
    %cst_7 = arith.constant dense<0.000000e+00> : vector<8x64xf32>
    %25 = tpu.matmul %23, %24, %cst_7 {dimension_numbers = #tpu.dot_dimension_numbers<[1], [0], [0], [1], [0, 0, 1, 1], [], []>} : vector<8x8xbf16>, vector<8x64xbf16>, vector<8x64xf32> -> vector<8x64xf32>
    %26 = arith.addf %21, %25 : vector<8x64xf32>
    %cst_8 = arith.constant 0.000000e+00 : f32
    %27 = vector.broadcast %cst_8 : f32 to vector<8x64xf32>
    %28 = arith.maximumf %26, %27 : vector<8x64xf32>
    %c0_9 = arith.constant 0 : index
    %c0_10 = arith.constant 0 : index
    %29 = vector.load %arg5[%c0_9, %c0_10] : memref<1x64xf32, #tpu.memory_space<vmem>>, vector<1x64xf32>
    %30 = vector.broadcast %29 : vector<1x64xf32> to vector<8x64xf32>
    %31 = arith.addf %28, %30 : vector<8x64xf32>
    %32 = arith.truncf %31 : vector<8x64xf32> to vector<8x64xbf16>
    %c0_11 = arith.constant 0 : index
    %c0_12 = arith.constant 0 : index
    %33 = vector.load %arg6[%c0_11, %c0_12] : memref<64x128xbf16, #tpu.memory_space<vmem>>, vector<64x128xbf16>
    %cst_13 = arith.constant dense<0.000000e+00> : vector<8x128xf32>
    %34 = tpu.matmul %32, %33, %cst_13 {dimension_numbers = #tpu.dot_dimension_numbers<[1], [0], [0], [1], [0, 0, 1, 1], [], []>} : vector<8x64xbf16>, vector<64x128xbf16>, vector<8x128xf32> -> vector<8x128xf32>
    %cst_14 = arith.constant 0.000000e+00 : f32
    %35 = vector.broadcast %cst_14 : f32 to vector<8x128xf32>
    %36 = arith.maximumf %34, %35 : vector<8x128xf32>
    %c0_15 = arith.constant 0 : index
    %c0_16 = arith.constant 0 : index
    %37 = vector.load %arg7[%c0_15, %c0_16] : memref<1x128xf32, #tpu.memory_space<vmem>>, vector<1x128xf32>
    %38 = vector.broadcast %37 : vector<1x128xf32> to vector<8x128xf32>
    %39 = arith.addf %36, %38 : vector<8x128xf32>
    %c0_17 = arith.constant 0 : index
    %c0_18 = arith.constant 0 : index
    %40 = vector.load %arg8[%c0_17, %c0_18] : memref<8x128xf32, #tpu.memory_space<vmem>>, vector<8x128xf32>
    tpu.vector_store %arg8[%c0_17, %c0_18], %39 {strides = array<i32>} : memref<8x128xf32, #tpu.memory_space<vmem>>, vector<8x128xf32>,
    return
  }
  func.func @transform_0(%arg0: i32) -> (i32, i32) {
    %c0_i32 = arith.constant 0 : i32
    %c0_i32_0 = arith.constant 0 : i32
    return %arg0, %c0_i32 : i32, i32
  }
  func.func @transform_1(%arg0: i32) -> (i32, i32) {
    %c0_i32 = arith.constant 0 : i32
    %c0_i32_0 = arith.constant 0 : i32
    return %arg0, %c0_i32 : i32, i32
  }
  func.func @transform_2(%arg0: i32) -> (i32, i32) {
    %c0_i32 = arith.constant 0 : i32
    %c0_i32_0 = arith.constant 0 : i32
    %c0_i32_1 = arith.constant 0 : i32
    return %c0_i32, %c0_i32_0 : i32, i32
  }
  func.func @transform_3(%arg0: i32) -> (i32, i32) {
    %c0_i32 = arith.constant 0 : i32
    %c0_i32_0 = arith.constant 0 : i32
    %c0_i32_1 = arith.constant 0 : i32
    return %c0_i32, %c0_i32_0 : i32, i32
  }
  func.func @transform_4(%arg0: i32) -> (i32, i32) {
    %c0_i32 = arith.constant 0 : i32
    %c0_i32_0 = arith.constant 0 : i32
    %c0_i32_1 = arith.constant 0 : i32
    return %c0_i32, %c0_i32_0 : i32, i32
  }
  func.func @transform_5(%arg0: i32) -> (i32, i32) {
    %c0_i32 = arith.constant 0 : i32
    %c0_i32_0 = arith.constant 0 : i32
    %c0_i32_1 = arith.constant 0 : i32
    return %c0_i32, %c0_i32_0 : i32, i32
  }
  func.func @transform_6(%arg0: i32) -> (i32, i32) {
    %c0_i32 = arith.constant 0 : i32
    %c0_i32_0 = arith.constant 0 : i32
    %c0_i32_1 = arith.constant 0 : i32
    return %c0_i32, %c0_i32_0 : i32, i32
  }
  func.func @transform_7(%arg0: i32) -> (i32, i32) {
    %c0_i32 = arith.constant 0 : i32
    %c0_i32_0 = arith.constant 0 : i32
    return %arg0, %c0_i32 : i32, i32
  }
}

</mosaic_0001>

<bundles_post_ra>
// kernel: tpu_custom_call.1
= control target key start
LH: loop header
LB: loop body
LE: loop exit
PB: predicated region body
PF: predicated region fallthrough
CT: control target
= control target key end

     0   :  { %12 = vsyncpa [#allocation3], 0  ;;  %s558_s0 = inlined_call_operand.vmem [shape: s32[8,3], index: 0, kind: input, shape index: {}]   ;;  %s559_s1 = inlined_call_operand.hbm [shape: f32[8,8], index: 1, kind: input, shape index: {}]   ;;  %s560_s2 = inlined_call_operand.vmem [shape: bf16[32,64], index: 2, kind: input, shape index: {}]   ;;  %s561_s3 = inlined_call_operand.vmem [shape: bf16[8,64], index: 3, kind: input, shape index: {}]   ;;  %s562_s4 = inlined_call_operand.vmem [shape: f32[1,64], index: 4, kind: input, shape index: {}]   ;;  %s563_s5 = inlined_call_operand.hbm [shape: bf16[64,128], index: 5, kind: input, shape index: {}]   ;;  %s564_s6 = inlined_call_operand.vmem [shape: f32[1,128], index: 6, kind: input, shape index: {}]   ;;  %s565_s7 = inlined_call_operand.hbm [shape: f32[8,128], index: 7, kind: output, shape index: {}]  }
   0x1   :  { %13 = vsyncpa [#allocation6], 0 }
   0x2   :  { %14 = vsyncpa [#allocation4], 0  ;;  %s447_s24 = smov [#allocation2]   ;;  %s448_s26 = smov [#allocation5]  }
   0x3   :  { %s23_s25 = sshll.u32 %s447_s24, 4  ;;  %s38_s27 = sshll.u32 %s448_s26, 4  ;;  %s24_s25 = int_to_ptr.vmem [resolvable:$true] %s23_s25  ;;  %s497_s27 = int_to_ptr.vmem [resolvable:$true] %s38_s27 }
   0x4   :  { %s375_s30 = scalar_lea.hbm %s559_s1, 128 }
   0x5   :  { %p376_p0 = scmp.ne.s32.totalorder %s559_s1, %s375_s30  ;;  %p379_p1 = scmp.lt.u32.totalorder %s375_s30, %s559_s1 }
   0x7   :  { %p381_p2 = pnand %p379_p1, %p376_p0 }
   0x9   :  { %384 = shalt.err (!%p381_p2)
}
   0xa   :  { %s385_s12 = scalar_lea.vmem %s24_s25, 128  ;;  %p390_p4 = scmp.lt.s32.totalorder %s24_s25, %s24_s25 }
   0xb   :  { %p386_p3 = scmp.ne.s32.totalorder %s24_s25, %s385_s12  ;;  %p391_p5 = scmp.lt.s32.totalorder %s385_s12, %s385_s12 }
   0xd   :  { %p392_p6 = por %p391_p5, %p390_p4 }
   0xf   :  { %p393_p7 = pnand %p392_p6, %p386_p3 }
  0x11   :  { %396 = shalt.err (!%p393_p7)
}
  0x12   :  { %26 = dma.hbm_to_vmem [thread:$0]  %s559_s1, 128, %s24_s25, [#allocation3]  }
  0x13   :  { %s397_s17 = scalar_lea.hbm %s563_s5, 512 }
  0x14   :  { %p398_p8 = scmp.ne.s32.totalorder %s563_s5, %s397_s17  ;;  %p401_p9 = scmp.lt.u32.totalorder %s397_s17, %s563_s5 }
  0x16   :  { %p403_p10 = pnand %p401_p9, %p398_p8 }
  0x18   :  { %406 = shalt.err (!%p403_p10)
}
  0x19   :  { %s407_s22 = scalar_lea.vmem %s497_s27, 512  ;;  %p412_p12 = scmp.lt.s32.totalorder %s497_s27, %s497_s27 }
  0x1a   :  { %p408_p11 = scmp.ne.s32.totalorder %s497_s27, %s407_s22  ;;  %p413_p13 = scmp.lt.s32.totalorder %s407_s22, %s407_s22 }
  0x1c   :  { %p414_p0 = por %p413_p13, %p412_p12 }
  0x1e   :  { %p415_p1 = pnand %p414_p0, %p408_p11 }
  0x20   :  { %418 = shalt.err (!%p415_p1)
}
  0x21   :  { %s449_s1 = smov 64   ;;  %s450_s23 = smov 4  }
  0x22   :  { %44 = dma.hbm_to_vmem [thread:$0]  %s563_s5, 512, %s497_s27, [#allocation6], %s449_s1, %s449_s1, %s450_s23  }
  0x23   :  { %441 = dma.done.wait [#allocation3], 128  }
  0x24   :  { %442 = vsyncadd [#allocation3], 4294967168 }
  0x25   :  { %443 = dma.done.wait [#allocation6], 512  }
  0x26   :  { %444 = vsyncadd [#allocation6], 4294966784  ;;  %v451_v0 = vmov 0   ;;  %v452_v1 = vmov 2   ;;  %v453_v2 = vmov 0.0   ;;  %vm89_vm0 = vcmask 1043456  }
  0x27   :  { %365 = vset.pattern.permute.xlu0 %v451_v0  ;;  %367 = vset.pattern.permute.xlu1 %v452_v1  ;;  %v54_v3 = vld [vmem:[%s558_s0] sm:$0xff]  ;;  %v82_v5 = vld [vmem:[#allocation2] sm:$0xff]  ;;  %vm454_vm1 = vmmov 0   ;;  %vm85_vm2 = vcmask 64512   ;;  %v455_v9 = vmov 1   ;;  %v370_v10 = vld [vmem:[%s560_s2 + $0x8] sm:$0xff]   ;;  %v55_v13 = vlaneseq }
  0x28   :  { %325 = vmatprep.subr.bf16.mxu0 %v453_v2  ;;  %339 = vmatprep.subr.bf16.mxu1 %v453_v2  ;;  %v84_v4 = vld [vmem:[%s561_s3] sm:$0xf]  ;;  %v83_v7 = vpack.c.bf16 %v82_v5, %v82_v5  ;;  %v371_v11 = vld [vmem:[#allocation5] sm:$0xff]   ;;  %vm145_vm6 = vcmask 261120   ;;  %v373_v24 = vld [vmem:[#allocation5 + $0x10] sm:$0xff]   ;;  %vm231_vm7 = vcmask 523264  }
  0x29   :  { %58 = vperm.xlu0 %365, %v54_v3   ;;  %71 = vperm.xlu1 %367, %v54_v3   ;;  %v91_v6 = vsel %vm89_vm0, %v84_v4, 0  ;;  %v369_v8 = vld [vmem:[%s560_s2] sm:$0xff]   ;;  %v56_v14 = vand.u32 127, %v55_v13  ;;  %v374_v25 = vld [vmem:[#allocation5 + $0x18] sm:$0xff]   ;;  %s456_s11 = smov [#allocation7]  }
  0x2a   :  { %326 = vmatpush3.bf16.msra.mxu0 %v91_v6  ;;  %327 = vmatprep.mubr.msk.bf16.mxu0 %vm454_vm1, %v453_v2  ;;  %v372_v12 = vld [vmem:[#allocation5 + $0x8] sm:$0xff]   ;;  %s291_s12 = sshll.u32 %s456_s11, 4  ;;  %s292_s12 = int_to_ptr.vmem [resolvable:$true] %s291_s12 }
  0x2b   :  { %331 = vmatprep.subr.bf16.mxu0 %v453_v2  ;;  %347 = vmatprep.mubr.msk.bf16.mxu1 %vm454_vm1, %v453_v2  ;;  %v308_v27 = vld [vmem:[%s562_s4] ss:$0 sm:$0xff]  ;;  %s419_s4 = scalar_lea.vmem %s292_s12, 128  ;;  %p424_p3 = scmp.lt.s32.totalorder %s292_s12, %s292_s12 }
  0x2c   :  { %340 = vmatpush3.bf16.msra.mxu1 %v371_v11  ;;  %v314_v35 = vld [vmem:[%s564_s6] ss:$0 sm:$0xff]  ;;  %p420_p2 = scmp.ne.s32.totalorder %s292_s12, %s419_s4  ;;  %p425_p4 = scmp.lt.s32.totalorder %s419_s4, %s419_s4 }
  0x2d   :  { %366 = vset.pattern.permute.xlu0 %v455_v9  ;;  %328 = vmatmul.mubr.msk.bf16.vlgmr.msra.gmra.mrb[0].mxu0 %vm85_vm2, %v83_v7 }
  0x2e   :  { %64 = vperm.xlu0 %366, %v54_v3   ;;  %332 = vmatpush3.bf16.msra.mxu0 %v369_v8  ;;  %p426_p5 = por %p425_p4, %p424_p3 }
  0x2f   :  { %333 = vmatprep.subr.bf16.mxu0 %v453_v2  ;;  %335 = vmatprep.mubr.msk.bf16.mxu0 %vm454_vm1, %v453_v2 }
  0x30   :  { %341 = vmatprep.subr.bf16.mxu1 %v453_v2  ;;  %p427_p6 = pnand %p426_p5, %p420_p2 }
  0x31   :  { %342 = vmatpush3.bf16.msra.mxu1 %v372_v12 }
  0x32   :  { %368 = vset.pattern.permute.xlu0 %v452_v1  ;;  %334 = vmatpush3.bf16.msra.mxu0 %v370_v10 }
  0x33   :  { %343 = vmatprep.subr.bf16.mxu1 %v453_v2 }
  0x35   :  { %344 = vmatpush3.bf16.msra.mxu1 %v373_v24 }
  0x36   :  { %345 = vmatprep.subr.bf16.mxu1 %v453_v2 }
  0x39   :  { %346 = vmatpush3.bf16.msra.mxu1 %v374_v25 }
  0xa8   :  { %v59_v15 = vpop.permute.xlu0 %58  ;;  %v72_v16 = vpop.permute.xlu1 %71 }
  0xa9   :  { %vm60_vm3 = vcmp.eq.s32.totalorder %v59_v15, %v56_v14  ;;  %vm73_vm4 = vcmp.eq.s32.totalorder %v72_v16, %v56_v14 }
  0xaa   :  { %v301_v18 = vsel %vm60_vm3, 1.0, %v453_v2  ;;  %v303_v20 = vsel %vm73_vm4, 1.0, %v453_v2 }
  0xad   :  { %v65_v17 = vpop.permute.xlu0 %64 }
  0xae   :  { %vm66_vm5 = vcmp.eq.s32.totalorder %v65_v17, %v56_v14 }
  0xaf   :  { %v302_v19 = vsel %vm66_vm5, 1.0, %v453_v2 }
  0xb0   :  { %v69_v21 = vadd.f32 %v302_v19, %v301_v18 }
  0xb2   :  { %v76_v22 = vadd.f32 %v303_v20, %v69_v21 }
  0xb4   :  { %v77_v23 = vpack.c.bf16 %v76_v22, %v76_v22 }
  0xb6   :  { %336 = vmatmul.mubr.msk.bf16.vlgmr.msra.gmra.mrb[0].mxu0 %vm145_vm6, %v77_v23 }
 0x189   :  { %v183_v26 = vpop.f32.mrb[0].mxu0 }
 0x18a   :  { %v189_v28 = vmax.f32 %v183_v26, 0.0  ;;  %v337_v29 = vpop.f32.mrb[1].mxu0 }
 0x18b   :  { %v186_v30 = vpop.f32.mrb[2].mxu0 }
 0x18c   :  { %v197_v31 = vadd.f32 %v308_v27, %v189_v28  ;;  %v338_v32 = vpop.f32.mrb[3].mxu0 }
 0x18e   :  { %v198_v33 = vpack.c.bf16 %v197_v31, %v197_v31 }
 0x190   :  { %348 = vmatmul.mubr.msk.bf16.vlgmr.msra.gmra.mrb[0].mxu1 %vm231_vm7, %v198_v33 }
 0x263   :  { %v269_v34 = vpop.f32.mrb[0].mxu1 }
 0x264   :  { %v275_v36 = vmax.f32 %v269_v34, 0.0  ;;  %v349_v37 = vpop.f32.mrb[1].mxu1 }
 0x265   :  { %v272_v38 = vpop.f32.mrb[2].mxu1 }
 0x266   :  { %v283_v39 = vadd.f32 %v314_v35, %v275_v36  ;;  %v350_v40 = vpop.f32.mrb[3].mxu1 }
 0x268   :  { %284 = vst [vmem:[#allocation7] sm:$0xff] %v283_v39 }
 0x269   :  { %430 = shalt.err (!%p427_p6)
}
 0x26a   :  { %s431_s6 = scalar_lea.hbm %s565_s7, 128 }
 0x26b   :  { %p432_p7 = scmp.ne.s32.totalorder %s565_s7, %s431_s6  ;;  %p435_p8 = scmp.lt.u32.totalorder %s431_s6, %s565_s7 }
 0x26d   :  { %p437_p9 = pnand %p435_p8, %p432_p7 }
 0x26f   :  { %440 = shalt.err (!%p437_p9)
}
 0x270   :  { %294 = dma.vmem_to_hbm [thread:$0]  %s292_s12, 128, %s565_s7, [#allocation4]  }
 0x271   :  { %445 = dma.done.wait [#allocation4], 128  }
 0x272   :  { %446 = vsyncadd [#allocation4], 4294967168 }
 0x273   :  { %298 = vsyncpa [#allocation3], 1 }
 0x274   :  { %299 = vsyncpa [#allocation6], 1 }
 0x275   :  { %300 = vsyncpa [#allocation4], 1 }

</bundles_post_ra>
